<compile_context>
chip_gen: v6e
topology: v6e:2x2x1
jax: 0.10.0
libtpu: 0.0.40
codegen_flags: <defaults>
</compile_context>

<pallas_src>
import functools
import math

import jax
import jax.numpy as jnp
from jax.experimental import pallas as pl
from jax.experimental.pallas import tpu as pltpu


_LANE = 128
_TILE_CANDIDATES = (2048, 1024, 512, 256, 128)   # lanes per grid step (largest that fits budget)
_VMEM_BLOCK_BUDGET = 12 * 1024 * 1024            # bytes for double-buffered in+out blocks


def _round_up(x, m):
    return ((x + m - 1) // m) * m


def _same_pad_amount(channels, stride, kernel_size):
    # NOTE: faithfully reproduces the original module, which computes the "same" padding from
    # x.shape[-2] (the CHANNEL dim of an NCL tensor), not the length dim.
    extra = (math.ceil(channels / stride) - 1) * stride - channels + kernel_size
    left = extra // 2
    right = extra - left
    return left, right


def _pad_or_crop_length(x, left, right):
    """F.pad semantics on the last dim: negative amounts crop."""
    if left < 0:
        x = x[:, :, -left:]
        left = 0
    if right < 0:
        x = x[:, :, : x.shape[2] + right]
        right = 0
    if left or right:
        x = jnp.pad(x, ((0, 0), (0, 0), (left, right)))
    return x


def _np_conv_kernel(slab_ref, w1p_ref, b1_ref, w2_ref, b2_ref, o_ref, *, q_taps, lt, inv_a, a):
    # slab_ref: (1, 1, stride*Cin, lt + halo) polyphase input window for this (batch, Lout-tile).
    # conv1 (strided same-pad conv) as Q polyphase GEMMs over unit-stride lane windows.
    acc = jnp.dot(w1p_ref[0], slab_ref[0, 0, :, 0:lt], preferred_element_type=jnp.float32)
    for q in range(1, q_taps):
        acc = acc + jnp.dot(w1p_ref[q], slab_ref[0, 0, :, q:q + lt],
                            preferred_element_type=jnp.float32)
    z1 = acc + b1_ref[...]                  # bias broadcast once (outside the tap loop)
    z1 = z1 * jax.nn.sigmoid(z1)            # Swish (sigmoid goes to the EUP)
    # conv2: 1x1 conv, stride 1 (its channel-based "same" padding is exactly 0) -> GEMM + bias.
    z2 = jnp.dot(w2_ref[...], z1, preferred_element_type=jnp.float32) + b2_ref[...]
    # Snake: x + sin(a*x)^2 * (1/a)  (multiply by precomputed reciprocal; no vector divide).
    y = z2 + jnp.square(jnp.sin(a * z2)) * inv_a
    o_ref[0] = y.astype(o_ref.dtype)


def np_conv_forward(x, w1, b1, w2, b2, *, stride, snakefactor):
    """x: (N, Cin, L); w1: (Cout, Cin, K); b1: (Cout,); w2: (Cout, Cout, 1); b2: (Cout,)."""
    if snakefactor == 0:
        raise ValueError("snakefactor must be nonzero (Snake divides by `a`).")

    N, Cin, L = x.shape
    Cout, _, K = w1.shape
    s = int(stride)

    # "same" padding (channel-based formula of the original module, reproduced exactly).
    left, right = _same_pad_amount(Cin, s, K)
    Lpad = L + left + right
    Lout = (Lpad - K) // s + 1

    halo = (K - 1) // s                      # extra columns each Lout-tile needs beyond `lt`
    q_taps = -(-K // s)                      # ceil(K / s) polyphase GEMMs inside the kernel

    # Lane-dense tiling of the output length, budgeted against scoped VMEM (double-buffered).
    Lout_pad = _round_up(Lout, _LANE)
    itemsize = 4
    cap = _LANE
    for cand in _TILE_CANDIDATES:
        blk_bytes = 2 * itemsize * (s * Cin * (cand + halo) + Cout * cand)
        if blk_bytes <= _VMEM_BLOCK_BUDGET:
            cap = cand
            break
    if Lout_pad <= cap:
        lt = Lout_pad                        # single tile covers the whole (padded) output
    else:
        lt = cap
        Lout_pad = _round_up(Lout_pad, lt)
    n_lt = Lout_pad // lt

    # Polyphase decomposition of the padded input: ph[n, p*Cin + c, g] = x_pad[n, c, s*g + p].
    G = Lout_pad + halo
    total_len = s * G
    xp = _pad_or_crop_length(x, left, right)               # the module's "same" padding
    if total_len >= xp.shape[2]:
        x_ext = jnp.pad(xp, ((0, 0), (0, 0), (0, total_len - xp.shape[2])))
    else:
        # Trailing samples past total_len are never touched by any valid output window.
        x_ext = xp[:, :, :total_len]
    ph = x_ext.reshape(N, Cin, G, s).transpose(0, 3, 1, 2).reshape(N, s * Cin, G)

    # Per-tile slabs (with `halo` overlap) so BlockSpec blocks are non-overlapping and lane-dense.
    if n_lt == 1:
        slabs = ph[:, None]                                 # (N, 1, s*Cin, lt + halo), no copy-fan
    else:
        slabs = jnp.stack(
            [jax.lax.slice_in_dim(ph, j * lt, j * lt + lt + halo, axis=2) for j in range(n_lt)],
            axis=1)                                         # (N, n_lt, s*Cin, lt + halo)

    # Polyphase conv1 weights: w1_poly[q, o, p*Cin + c] = w1[o, c, q*s + p] (zero where q*s+p >= K).
    w1_poly = jnp.zeros((q_taps, Cout, s * Cin), dtype=jnp.float32)
    for k in range(K):
        q, p = divmod(k, s)
        w1_poly = w1_poly.at[q, :, p * Cin:(p + 1) * Cin].set(w1[:, :, k].astype(jnp.float32))

    w2_2d = w2.reshape(Cout, Cout).astype(jnp.float32)      # 1x1 conv, stride 1 -> 0 same-padding
    b1c = b1.reshape(Cout, 1).astype(jnp.float32)
    b2c = b2.reshape(Cout, 1).astype(jnp.float32)

    a = float(snakefactor)
    kernel = functools.partial(_np_conv_kernel, q_taps=q_taps, lt=lt, inv_a=1.0 / a, a=a)

    out_pad = pl.pallas_call(
        kernel,
        out_shape=jax.ShapeDtypeStruct((N, Cout, Lout_pad), x.dtype),
        grid_spec=pltpu.PrefetchScalarGridSpec(
            num_scalar_prefetch=0,
            grid=(N, n_lt),
            in_specs=[
                pl.BlockSpec((1, 1, s * Cin, lt + halo), lambda n, j: (n, j, 0, 0)),
                # Constant index maps -> weights/biases are not re-fetched every grid step.
                pl.BlockSpec((q_taps, Cout, s * Cin), lambda n, j: (0, 0, 0)),
                pl.BlockSpec((Cout, 1), lambda n, j: (0, 0)),
                pl.BlockSpec((Cout, Cout), lambda n, j: (0, 0)),
                pl.BlockSpec((Cout, 1), lambda n, j: (0, 0)),
            ],
            out_specs=pl.BlockSpec((1, Cout, lt), lambda n, j: (n, 0, j)),
        ),
        compiler_params=pltpu.CompilerParams(
            dimension_semantics=("parallel", "parallel")),
    )(slabs, w1_poly, b1c, w2_2d, b2c)

    return out_pad[:, :, :Lout]


def np_conv_reference(x, w1, b1, w2, b2, *, stride, snakefactor):
    """Pure-JAX reference mirroring the PyTorch forward."""
    left, right = _same_pad_amount(x.shape[1], stride, w1.shape[2])
    xp = _pad_or_crop_length(x, left, right)
    y1 = jax.lax.conv_general_dilated(
        xp, w1, (stride,), "VALID", dimension_numbers=("NCH", "OIH", "NCH")
    ) + b1[None, :, None]
    y1 = y1 * jax.nn.sigmoid(y1)
    y2 = jax.lax.conv_general_dilated(
        y1, w2, (1,), "VALID", dimension_numbers=("NCH", "OIH", "NCH")
    ) + b2[None, :, None]
    a = snakefactor
    return y2 + jnp.sin(a * y2) ** 2 / a


if __name__ == "__main__":
    # Small shapes consistent with NP_Conv.  The module feeds conv1's output (chout channels) into
    # conv2 (declared with chin input channels), so chin == chout.
    N, chin, chout, L = 2, 8, 8, 16
    kernel_size, stride, snakefactor = 3, 2, 0.2

    key = jax.random.PRNGKey(0)
    kx, kw1, kb1, kw2, kb2 = jax.random.split(key, 5)

    x = jax.random.normal(kx, (N, chin, L), dtype=jnp.float32)

    # Deterministic parameter init (kaiming-normal-like weights, uniform biases).
    fan_in1 = chin * kernel_size
    w1 = jax.random.normal(kw1, (chout, chin, kernel_size), dtype=jnp.float32) * math.sqrt(2.0 / fan_in1)
    b1 = jax.random.uniform(kb1, (chout,), dtype=jnp.float32,
                            minval=-1.0 / math.sqrt(fan_in1), maxval=1.0 / math.sqrt(fan_in1))
    fan_in2 = chin * 1
    w2 = jax.random.normal(kw2, (chout, chin, 1), dtype=jnp.float32) * math.sqrt(2.0 / fan_in2)
    b2 = jax.random.uniform(kb2, (chout,), dtype=jnp.float32,
                            minval=-1.0 / math.sqrt(fan_in2), maxval=1.0 / math.sqrt(fan_in2))

    out = np_conv_forward(x, w1, b1, w2, b2, stride=stride, snakefactor=snakefactor)
    out = jax.block_until_ready(out)

    ref = np_conv_reference(x, w1, b1, w2, b2, stride=stride, snakefactor=snakefactor)
    assert out.shape == ref.shape, (out.shape, ref.shape)
    assert jnp.allclose(out, ref, atol=1e-5, rtol=1e-5), float(jnp.max(jnp.abs(out - ref)))

    print("KERNEL_OK")
</pallas_src>

<mosaic_0001>
module attributes {stable_mosaic.version = 11 : i64} {
  func.func @_np_conv_kernel(%arg0: i32, %arg1: i32, %arg2: memref<1x1x16x129xf32, #tpu.memory_space<vmem>>, %arg3: memref<2x8x16xf32, #tpu.memory_space<vmem>>, %arg4: memref<8x1xf32, #tpu.memory_space<vmem>>, %arg5: memref<8x8xf32, #tpu.memory_space<vmem>>, %arg6: memref<8x1xf32, #tpu.memory_space<vmem>>, %arg7: memref<1x8x128xf32, #tpu.memory_space<vmem>>) attributes {dimension_semantics = [#tpu.dimension_semantics<parallel>, #tpu.dimension_semantics<parallel>], iteration_bounds = array<i64: 2, 1>, scalar_prefetch = 0 : i64, scratch_operands = 0 : i64, tpu.core_type = #tpu.core_type<tc>, window_params = [{transform_indices = @transform_0, window_bounds = array<i64: 1, 1, 16, 129>}, {pipeline_mode = #tpu.pipeline_mode<synchronous>, transform_indices = @transform_1, window_bounds = array<i64: 2, 8, 16>}, {pipeline_mode = #tpu.pipeline_mode<synchronous>, transform_indices = @transform_2, window_bounds = array<i64: 8, 1>}, {pipeline_mode = #tpu.pipeline_mode<synchronous>, transform_indices = @transform_3, window_bounds = array<i64: 8, 8>}, {pipeline_mode = #tpu.pipeline_mode<synchronous>, transform_indices = @transform_4, window_bounds = array<i64: 8, 1>}, {transform_indices = @transform_5, window_bounds = array<i64: 1, 8, 128>}]} {
    %c0 = arith.constant 0 : index
    %c0_0 = arith.constant 0 : index
    %c0_1 = arith.constant 0 : index
    %0 = vector.load %arg3[%c0, %c0_0, %c0_1] : memref<2x8x16xf32, #tpu.memory_space<vmem>>, vector<1x8x16xf32>
    %1 = vector.shape_cast %0 : vector<1x8x16xf32> to vector<8x16xf32>
    %c0_2 = arith.constant 0 : index
    %c0_3 = arith.constant 0 : index
    %c0_4 = arith.constant 0 : index
    %c0_5 = arith.constant 0 : index
    %2 = vector.load %arg2[%c0_2, %c0_3, %c0_4, %c0_5] : memref<1x1x16x129xf32, #tpu.memory_space<vmem>>, vector<1x1x16x128xf32>
    %3 = vector.shape_cast %2 : vector<1x1x16x128xf32> to vector<16x128xf32>
    %cst = arith.constant dense<0.000000e+00> : vector<8x128xf32>
    %4 = tpu.matmul %1, %3, %cst {dimension_numbers = #tpu.dot_dimension_numbers<[1], [0], [0], [1], [0, 0, 1, 1], [], []>} : vector<8x16xf32>, vector<16x128xf32>, vector<8x128xf32> -> vector<8x128xf32>
    %c1 = arith.constant 1 : index
    %c0_6 = arith.constant 0 : index
    %c0_7 = arith.constant 0 : index
    %5 = vector.load %arg3[%c1, %c0_6, %c0_7] : memref<2x8x16xf32, #tpu.memory_space<vmem>>, vector<1x8x16xf32>
    %6 = vector.shape_cast %5 : vector<1x8x16xf32> to vector<8x16xf32>
    %c0_8 = arith.constant 0 : index
    %c0_9 = arith.constant 0 : index
    %c0_10 = arith.constant 0 : index
    %c1_11 = arith.constant 1 : index
    %7 = vector.load %arg2[%c0_8, %c0_9, %c0_10, %c1_11] : memref<1x1x16x129xf32, #tpu.memory_space<vmem>>, vector<1x1x16x128xf32>
    %8 = vector.shape_cast %7 : vector<1x1x16x128xf32> to vector<16x128xf32>
    %cst_12 = arith.constant dense<0.000000e+00> : vector<8x128xf32>
    %9 = tpu.matmul %6, %8, %cst_12 {dimension_numbers = #tpu.dot_dimension_numbers<[1], [0], [0], [1], [0, 0, 1, 1], [], []>} : vector<8x16xf32>, vector<16x128xf32>, vector<8x128xf32> -> vector<8x128xf32>
    %10 = arith.addf %4, %9 : vector<8x128xf32>
    %c0_13 = arith.constant 0 : index
    %c0_14 = arith.constant 0 : index
    %11 = vector.load %arg4[%c0_13, %c0_14] : memref<8x1xf32, #tpu.memory_space<vmem>>, vector<8x1xf32>
    %12 = vector.broadcast %11 : vector<8x1xf32> to vector<8x128xf32>
    %13 = arith.addf %10, %12 : vector<8x128xf32>
    %14 = arith.negf %13 : vector<8x128xf32>
    %15 = math.exp %14 : vector<8x128xf32>
    %cst_15 = arith.constant 1.000000e+00 : f32
    %16 = vector.broadcast %cst_15 : f32 to vector<8x128xf32>
    %17 = arith.addf %16, %15 : vector<8x128xf32>
    %18 = arith.divf %16, %17 : vector<8x128xf32>
    %19 = arith.mulf %13, %18 : vector<8x128xf32>
    %c0_16 = arith.constant 0 : index
    %c0_17 = arith.constant 0 : index
    %20 = vector.load %arg5[%c0_16, %c0_17] : memref<8x8xf32, #tpu.memory_space<vmem>>, vector<8x8xf32>
    %cst_18 = arith.constant dense<0.000000e+00> : vector<8x128xf32>
    %21 = tpu.matmul %20, %19, %cst_18 {dimension_numbers = #tpu.dot_dimension_numbers<[1], [0], [0], [1], [0, 0, 1, 1], [], []>} : vector<8x8xf32>, vector<8x128xf32>, vector<8x128xf32> -> vector<8x128xf32>
    %c0_19 = arith.constant 0 : index
    %c0_20 = arith.constant 0 : index
    %22 = vector.load %arg6[%c0_19, %c0_20] : memref<8x1xf32, #tpu.memory_space<vmem>>, vector<8x1xf32>
    %23 = vector.broadcast %22 : vector<8x1xf32> to vector<8x128xf32>
    %24 = arith.addf %21, %23 : vector<8x128xf32>
    %cst_21 = arith.constant 2.000000e-01 : f32
    %25 = vector.broadcast %cst_21 : f32 to vector<8x128xf32>
    %26 = arith.mulf %25, %24 : vector<8x128xf32>
    %27 = math.sin %26 : vector<8x128xf32>
    %28 = arith.mulf %27, %27 : vector<8x128xf32>
    %cst_22 = arith.constant 5.000000e+00 : f32
    %29 = vector.broadcast %cst_22 : f32 to vector<8x128xf32>
    %30 = arith.mulf %28, %29 : vector<8x128xf32>
    %31 = arith.addf %24, %30 : vector<8x128xf32>
    %c0_23 = arith.constant 0 : index
    %c0_24 = arith.constant 0 : index
    %c0_25 = arith.constant 0 : index
    %32 = vector.load %arg7[%c0_23, %c0_24, %c0_25] : memref<1x8x128xf32, #tpu.memory_space<vmem>>, vector<1x8x128xf32>
    %33 = vector.shape_cast %32 : vector<1x8x128xf32> to vector<8x128xf32>
    %34 = vector.shape_cast %31 : vector<8x128xf32> to vector<1x8x128xf32>
    tpu.vector_store %arg7[%c0_23, %c0_24, %c0_25], %34 {strides = array<i32>} : memref<1x8x128xf32, #tpu.memory_space<vmem>>, vector<1x8x128xf32>,
    return
  }
  func.func @transform_0(%arg0: i32, %arg1: i32) -> (i32, i32, i32, i32) {
    %c0_i32 = arith.constant 0 : i32
    %c0_i32_0 = arith.constant 0 : i32
    %c0_i32_1 = arith.constant 0 : i32
    return %arg0, %arg1, %c0_i32, %c0_i32_0 : i32, i32, i32, i32
  }
  func.func @transform_1(%arg0: i32, %arg1: i32) -> (i32, i32, i32) {
    %c0_i32 = arith.constant 0 : i32
    %c0_i32_0 = arith.constant 0 : i32
    %c0_i32_1 = arith.constant 0 : i32
    %c0_i32_2 = arith.constant 0 : i32
    return %c0_i32, %c0_i32_0, %c0_i32_1 : i32, i32, i32
  }
  func.func @transform_2(%arg0: i32, %arg1: i32) -> (i32, i32) {
    %c0_i32 = arith.constant 0 : i32
    %c0_i32_0 = arith.constant 0 : i32
    %c0_i32_1 = arith.constant 0 : i32
    return %c0_i32, %c0_i32_0 : i32, i32
  }
  func.func @transform_3(%arg0: i32, %arg1: i32) -> (i32, i32) {
    %c0_i32 = arith.constant 0 : i32
    %c0_i32_0 = arith.constant 0 : i32
    %c0_i32_1 = arith.constant 0 : i32
    return %c0_i32, %c0_i32_0 : i32, i32
  }
  func.func @transform_4(%arg0: i32, %arg1: i32) -> (i32, i32) {
    %c0_i32 = arith.constant 0 : i32
    %c0_i32_0 = arith.constant 0 : i32
    %c0_i32_1 = arith.constant 0 : i32
    return %c0_i32, %c0_i32_0 : i32, i32
  }
  func.func @transform_5(%arg0: i32, %arg1: i32) -> (i32, i32, i32) {
    %c0_i32 = arith.constant 0 : i32
    %c0_i32_0 = arith.constant 0 : i32
    return %arg0, %c0_i32, %arg1 : i32, i32, i32
  }
}

</mosaic_0001>

<bundles_post_ra>
// kernel: tpu_custom_call.1
= control target key start
LH: loop header
LB: loop body
LE: loop exit
PB: predicated region body
PF: predicated region fallthrough
CT: control target
= control target key end

     0   :  { %s1299_s0 = inlined_call_operand.hbm [shape: f32[2,1,16,129], index: 0, kind: input, shape index: {}]   ;;  %s1300_s1 = inlined_call_operand.vmem [shape: f32[2,8,16], index: 1, kind: input, shape index: {}]   ;;  %s1301_s2 = inlined_call_operand.vmem [shape: f32[8,1], index: 2, kind: input, shape index: {}]   ;;  %s1302_s3 = inlined_call_operand.hbm [shape: f32[8,8], index: 3, kind: input, shape index: {}]   ;;  %s1303_s4 = inlined_call_operand.vmem [shape: f32[8,1], index: 4, kind: input, shape index: {}]   ;;  %s1304_s5 = inlined_call_operand.hbm [shape: f32[2,8,128], index: 5, kind: output, shape index: {}]  }
   0x1   :  { %1310 = sst [smem:[#allocation13_spill]] %s1302_s3 }
   0x2   :  { %10 = vsyncpa [#allocation3], 0 }
   0x3   :  { %12 = vsyncpa [#allocation3 + $0x1], 0 }
   0x4   :  { %13 = vsyncpa [#allocation6], 0 }
   0x5   :  { %14 = vsyncpa [#allocation4], 0 }
   0x6   :  { %16 = vsyncpa [#allocation4 + $0x1], 0  ;;  %s1093_s18 = smov 0   ;;  %s1095_s19 = smov 0  }
   0x7   :  { %s1097_s20 = smov 0   ;;  %s1099_s21 = smov 0  }
   0x8   :  { %s1101_s22 = smov 0   ;;  %s1103_s23 = smov 0  }
   0x9 LB: > { %1311 = sst [smem:[#allocation11_spill]] %s1046_s23  ;;  %s756_s24 = sadd.s32 4294967295, %s1046_s23   ;;  %s1046_s23 = sphi %s1103_s23, %s22_s23   ;;  %s1042_s22 = sphi %s1101_s22, %s1333_s22   ;;  %s1038_s21 = sphi %s1099_s21, %s1332_s21   ;;  %s1034_s20 = sphi %s1097_s20, %s1331_s20   ;;  %s1030_s19 = sphi %s1095_s19, %s1330_s19   ;;  %s1026_s18 = sphi %s1093_s18, %s1329_s18  }
   0xa   : > { %s757_s25 = sadd.s32 4294967294, %s1046_s23   ;;  %p50_p0 = scmp.ne.s32.totalorder %s1034_s20, %s1030_s19 }
   0xb   : > { %p51_p1 = scmp.eq.s32.totalorder %s1046_s23, 0  ;;  %p56_p2 = scmp.ne.s32.totalorder %s1030_s19, %s1026_s18 }
   0xc   : > { %p1131_p3 = scmp.eq.s32.totalorder %s756_s24, 0  ;;  %p166_p4 = scmp.eq.s32.totalorder %s756_s24, 1 }
   0xd   : > { %p1135_p5 = por %p51_p1, %p50_p0  ;;  %p172_p6 = scmp.eq.s32.totalorder %s757_s25, 1 }
   0xe   : > { %p1141_p7 = por %p1131_p3, %p56_p2  ;;  %p1145_p8 = por %p166_p4, %p50_p0 }
   0xf   : > { %p1149_p9 = por %p172_p6, %p56_p2  ;;  %p758_p10 = scmp.ge.s32.totalorder %s1046_s23, 1 }
  0x10   : > { %s1314_s29 = scalar_select %p1141_p7, 1, 0 }
  0x11   : > { %s1315_s30 = scalar_select %p1145_p8, 1, 0 }
  0x12   : > { %s1316_s6 = scalar_select %p1149_p9, 1, 0 }
  0x13   : > { %p179_p11 = scmp.lt.s32.totalorder %s1046_s23, 3  ;;  %s1048_s8 = smov [#allocation5]  }
  0x14   : > { %s198_s9 = sshll.u32 %s1048_s8, 4  ;;  %p834_p1 = scmp.lt.s32.totalorder %s1046_s23, 2  ;;  %s199_s9 = int_to_ptr.vmem [resolvable:$true] %s198_s9 }
  0x15   : > { %p1156_p13 = pnand %p758_p10, %p179_p11  ;;  %s34_s12 = sadd.s32 1, %s1042_s22 }
  0x16   : > { %p1165_p4 = pnand %p834_p1, %p1135_p5  ;;  %p36_p6 = scmp.ge.s32.totalorder %s34_s12, 2 }
  0x17   : > { %p821_p0 = pneg %p1156_p13  ;;  %s212_s13 = sand.u32 1, %s1034_s20  }
  0x18   : > { %s919_s14 = scalar_lea.vmem %s199_s9, 128  ;;  %p927_p8 = scmp.lt.s32.totalorder %s199_s9, %s199_s9 }
  0x19   : > { %p1171_p2 = pnand %p821_p0, %p1131_p3  ;;  %p920_p11 = scmp.ne.s32.totalorder %s199_s9, %s919_s14 }
  0x1a   : > { %p928_p5 = scmp.lt.s32.totalorder %s919_s14, %s919_s14 }
  0x1b   : > { %p910_p10 = pneg %p1171_p2 }
  0x1c   : > { %p929_p1 = por %p928_p5, %p927_p8 }
  0x1d   : > { %p922_p12 = pnand %p920_p11, %p910_p10 }
  0x1f   : > { %p923_p9 = pneg %p922_p12 }
  0x21   : > { %p930_p7 = pnand %p929_p1, %p923_p9 }
  0x23   : > { %933 = shalt.err (!%p930_p7)
}
  0x24   : > { %s1320_s3 = sld [smem:[#allocation13_spill]]  ;;  %s1335_s12 = smov (%p36_p6, %s34_s12), 0 }
  0x25   : > { %1321 = sst [smem:[#allocation12_spill]] %s1335_s12  ;;  %s761_s17 = sshll.u32 %s212_s13, 5 }
  0x26   : > { %s38_s24 = ssub.s32 %s1042_s22, %s1335_s12  ;;  %s781_s25 = sshll.u32 %s1042_s22, 9 }
  0x27   : > { %p41_p12 = scmp.eq.s32.totalorder %s38_s24, 0  ;;  %s224_s11 = scalar_lea.hbm %s1299_s0, %s781_s25 }
  0x28   : > { %s216_s14 = scalar_lea.vmem [#allocation2], %s761_s17  ;;  %s1322_s15 = sadd.s32 1, %s1034_s20 }
  0x29   : > { %s225_s26 = sshll.u32 %s216_s14, 4  ;;  %s213_s23 = scalar_lea.sflag [#allocation3], %s212_s13  ;;  %s226_s26 = int_to_ptr.vmem [resolvable:$true] %s225_s26 }
  0x2a   : > { %824 = dma.hbm_to_vmem [thread:$0]  (!%p1171_p2), %s1320_s3, 128, %s199_s9, [#allocation6]  }
  0x2b   : > { %s1195_s16 = scalar_select %p41_p12, %s1034_s20, %s1322_s15  }
  0x2c   : > { %p936_p7 = pneg %p1165_p4  ;;  %s947_s9 = scalar_lea.vmem %s226_s26, 512 }
  0x2d   : > { %p948_p8 = scmp.ne.s32.totalorder %s226_s26, %s947_s9  ;;  %s1049_s3 = smov [#allocation2]  }
  0x2e   : > { %s952_s24 = sshll.u32 %s1049_s3, 4  ;;  %s953_s24 = int_to_ptr.vmem [resolvable:$false] %s952_s24 }
  0x2f   : > { %p950_p9 = pnand %p948_p8, %p936_p7  ;;  %s954_s12 = scalar_lea.vmem %s953_s24, 1024 }
  0x30   : > { %p955_p2 = scmp.lt.s32.totalorder %s226_s26, %s953_s24  ;;  %p956_p6 = scmp.lt.s32.totalorder %s954_s12, %s947_s9 }
  0x31   : > { %p951_p0 = pneg %p950_p9 }
  0x32   : > { %p957_p10 = por %p956_p6, %p955_p2 }
  0x34   : > { %p958_p11 = pnand %p957_p10, %p951_p0 }
  0x36   : > { %961 = shalt.err (!%p958_p11)
}
  0x37   : > { %s1050_s17 = smov 256   ;;  %s1051_s25 = smov 16  }
  0x38   : > { %828 = dma.hbm_to_vmem [thread:$0]  (!%p1165_p4), %s224_s11, 512, %s226_s26, %s213_s23, %s1050_s17, %s1050_s17, %s1051_s25  }
  0x39   : > { %237 = sbr.rel (%p1156_p13) target bundleno = 722 (0x2d2), region = 40  ;;  %s1204_s13 = sand.u32 (!%p1156_p13), 1, %s1030_s19  }
  0x3a   : > { %s765_s3 = sshll.u32 (!%p1156_p13), %s1204_s13, 5  ;;  %s240_s28 = scalar_lea.sflag (!%p1156_p13), [#allocation3], %s1204_s13 }
  0x3b   : > { %s243_s12 = scalar_lea.vmem (!%p1156_p13), [#allocation2], %s765_s3  ;;  %p1323_p5 = scmp.ne.s32.totalorder (!%p1156_p13), %s1314_s29, 0 }
  0x3e   : > { %1013 = dma.done.wait (%p1323_p5), %s240_s28, 512  }
  0x3f   : > { %1015 = vsyncadd (%p1323_p5), %s240_s28, 4294966784 }
  0x40   : > { %1017 = dma.done.wait (%p1131_p3), [#allocation6], 128  }
  0x41   : > { %1019 = vsyncadd (%p1131_p3), [#allocation6], 4294967168  ;;  %v1052_v0 = vmov 0.0   ;;  %vm1053_vm0 = vmmov 0   ;;  %v1054_v1 = vmov 0   ;;  %v276_v2 = vld [vmem:[%s243_s12 + $0x10] sm:$0xff] }
  0x42   : > { %797 = vmatprep.subr.mxu1 %v1052_v0  ;;  %790 = vmatprep.subr.mxu0 %v1052_v0  ;;  %v275_v3 = vld [vmem:[%s243_s12] sm:$0xff]  ;;  %s1055_s23 = smov 127   ;;  %v280_v4 = vld [vmem:[%s243_s12 + $0x18] sm:$0xff]  ;;  %v279_v5 = vld [vmem:[%s243_s12 + $0x8] sm:$0xff]  ;;  %vm298_vm1 = vcmask 130048   ;;  %vm293_vm2 = vcmask 1039360  }
  0x43   : > { %801 = vmatprep.mubr.msk.f32.mxu1 %vm1053_vm0, %v1052_v0  ;;  %794 = vmatprep.mubr.msk.f32.mxu0 %vm1053_vm0, %v1052_v0  ;;  %v274_v6 = vld [vmem:[%s1300_s1] sm:$0xff]  ;;  %v768_v13 = vld [vmem:[%s1300_s1 + $0x8] sm:$0xff]  ;;  %vm466_vm3 = vcmask 64512   ;;  %v1056_v44 = vmov 683565275   ;;  %s767_s15 = sshll.u32 %s1204_s13, 3 }
  0x44   : > { %898 = vset.pattern.permute.xlu0 %v1054_v1  ;;  %899 = vset.pattern.permute.xlu1 %v1054_v1  ;;  %v445_v7 = vld [vmem:[%s1301_s2] sm:$0xff]  ;;  %v1057_v46 = vmov 2475754826   ;;  %v1058_v49 = vmov 2131351028   ;;  %s778_s9 = sshll.u32 %s1038_s21, 7 }
  0x45   : > { %289 = vrot.lane.b32.xlu0 %v276_v2, %s1055_s23  ;;  %285 = vrot.lane.b32.xlu1 %v275_v3, %s1055_s23  ;;  %v460_v17 = vld [vmem:[%s1303_s4] sm:$0xff]  ;;  %v1059_v52 = vmov 2102212464   ;;  %v1060_v55 = vmov 920167782   ;;  %s273_s24 = scalar_lea.vmem [#allocation7], %s767_s15  ;;  %s662_s28 = scalar_lea.hbm %s1304_s5, %s778_s9 }
  0x46   : > { %798 = vmatpush3.msra.mxu1 %v276_v2  ;;  %v459_v28 = vld [vmem:[#allocation5] sm:$0xff]  ;;  %v1061_v58 = vmov 1326507024   ;;  %s664_s17 = sshll.u32 %s273_s24, 4  ;;  %s650_s12 = scalar_lea.sflag [#allocation4], %s1204_s13  ;;  %s665_s17 = int_to_ptr.vmem [resolvable:$true] %s664_s17 }
  0x47   : > { %799 = vmatprep.subr.mxu1 %v1052_v0  ;;  %p1324_p13 = scmp.ne.s32.totalorder %s1315_s30, 0  ;;  %s1062_s26 = smov [#allocation7]  }
  0x48   : > { %800 = vmatpush3.msra.mxu1 %v275_v3  ;;  %s966_s27 = sshll.u32 %s1062_s26, 4  ;;  %s967_s27 = int_to_ptr.vmem [resolvable:$false] %s966_s27 }
  0x49   : > { %291 = vrot.lane.b32.xlu0 %v280_v4, %s1055_s23  ;;  %287 = vrot.lane.b32.xlu1 %v279_v5, %s1055_s23  ;;  %s962_s23 = scalar_lea.vmem %s665_s17, 128  ;;  %s968_s21 = scalar_lea.vmem %s967_s27, 256 }
  0x4a   : > { %802 = vmatmul.mubr.msk.f32.vlgmr.msra.gmra.mxu1 %vm298_vm1, %v274_v6  ;;  %p963_p3 = scmp.ne.s32.totalorder %s665_s17, %s962_s23  ;;  %p969_p12 = scmp.lt.s32.totalorder %s665_s17, %s967_s27 }
  0x4b   : > { %p970_p7 = scmp.lt.s32.totalorder %s968_s21, %s962_s23 }
  0x4c   : > { %p964_p4 = pnand %p963_p3, %p1324_p13 }
  0x4d   : > { %448 = vperm.xlu0 %898, %v445_v7   ;;  %463 = vperm.xlu1 %899, %v460_v17   ;;  %p971_p8 = por %p970_p7, %p969_p12 }
  0x4e   : > { %p965_p1 = pneg %p964_p4 }
  0x50   : > { %p972_p9 = pnand %p971_p8, %p965_p1 }
  0xb7   : > { %v290_v8 = vpop.permute.xlu0 %289  ;;  %v286_v9 = vpop.permute.xlu1 %285 }
  0xbb   : > { %v292_v10 = vpop.permute.xlu0 %291  ;;  %v288_v11 = vpop.permute.xlu1 %287 }
  0xbc   : > { %v295_v12 = vsel %vm293_vm2, %v290_v8, %v292_v10  ;;  %v294_v14 = vsel %vm293_vm2, %v286_v9, %v288_v11 }
  0xbd   : > { %791 = vmatpush3.msra.mxu0 %v295_v12 }
  0xbe   : > { %792 = vmatprep.subr.mxu0 %v1052_v0 }
  0xbf   : > { %793 = vmatpush3.msra.mxu0 %v294_v14 }
  0xc0   : > { %795 = vmatmul.mubr.msk.f32.vlgmr.msra.gmra.mxu0 %vm298_vm1, %v768_v13  ;;  %804 = vmatprep.subr.mxu0 %v1052_v0 }
  0xc1   : > { %806 = vmatprep.mubr.msk.f32.mxu0 %vm1053_vm0, %v1052_v0 }
  0xc8   : > { %v449_v19 = vpop.permute.xlu0 %448  ;;  %v464_v29 = vpop.permute.xlu1 %463 }
 0x10a   : > { %v441_v15 = vpop.f32.mrf.mxu1 }
 0x10c   : > { %v803_v16 = vpop.f32.mrf.mxu1 }
 0x180   : > { %v368_v18 = vpop.f32.mrf.mxu0 }
 0x181   : > { %v442_v20 = vadd.f32 %v441_v15, %v368_v18 }
 0x182   : > { %v796_v21 = vpop.f32.mrf.mxu0 }
 0x183   : > { %v451_v22 = vadd.f32 %v449_v19, %v442_v20 }
 0x185   : > { %v771_v23 = vmul.f32 -1.442695, %v451_v22 }
 0x187   : > { %900 = vpow2.f32 %v771_v23 }
 0x194   : > { %v901_v24 = vpop.eup %900 }
 0x195   : > { %v455_v25 = vadd.f32 1.0, %v901_v24 }
 0x197   : > { %902 = vrcp.f32 %v455_v25 }
 0x1a4   : > { %v903_v26 = vpop.eup %902 }
 0x1a5   : > { %v458_v27 = vmul.f32 %v903_v26, %v451_v22 }
 0x1a7   : > { %805 = vmatpush3.msra.mxu0 %v458_v27 }
 0x1a8   : > { %807 = vmatmul.mubr.msk.f32.vlgmr.msra.gmra.mxu0 %vm466_vm3, %v459_v28 }
 0x268   : > { %v536_v30 = vpop.f32.mrf.mxu0 }
 0x269   : > { %v1233_v31 = vadd.f32 %v536_v30, %v464_v29 }
 0x26a   : > { %v808_v32 = vpop.f32.mrf.mxu0 }
 0x26b   : > { %v1236_v33 = vmul.f32 0.2, %v1233_v31 }
 0x26d   : > { %v544_v34 = vand.u32 2139095040, %v1236_v33  ;;  %v541_v38 = vand.u32 2147483647, %v1236_v33  ;;  %vm543_vm11 = vcmp.lt.s32.totalorder %v1236_v33, 0  ;;  %vm633_vm0 = vweird.f32 %v1236_v33 }
 0x26f   : > { %v545_v35 = vshrl.u32 %v544_v34, 23  ;;  %v548_v41 = vand.u32 8388607, %v541_v38  ;;  %vm542_vm12 = vcmp.le.f32.partialorder %v541_v38, 0.7853982 }
 0x271   : > { %v773_v36 = vadd.s32 4294967169, %v545_v35  ;;  %v549_v60 = vor.u32 8388608, %v548_v41 }
 0x273   : > { %v551_v37 = vadd.s32 1, %v773_v36  ;;  %v589_v10 = vshll.u32 %v549_v60, 8 }
 0x275   : > { %vm552_vm4 = vcmp.gt.s32.totalorder %v551_v37, 0 }
 0x276   : > { %v553_v39 = vsel %vm552_vm4, %v551_v37, 0 }
 0x277   : > { %v555_v40 = vand.u32 31, %v553_v39  ;;  %v554_v43 = vshrl.u32 %v553_v39, 5 }
 0x279   : > { %v556_v42 = vsub.s32 32, %v555_v40  ;;  %v558_v45 = vshll.u32 %v1056_v44, %v555_v40  ;;  %v561_v47 = vshll.u32 %v1057_v46, %v555_v40  ;;  %v564_v51 = vshll.u32 %v1058_v49, %v555_v40 }
 0x27a   : > { %v567_v54 = vshll.u32 %v1059_v52, %v555_v40  ;;  %v570_v57 = vshll.u32 %v1060_v55, %v555_v40  ;;  %vm573_vm5 = vcmp.lt.s32.totalorder %v554_v43, 1  ;;  %vm576_vm6 = vcmp.lt.s32.totalorder %v554_v43, 4 }
 0x27b   : > { %v559_v48 = vshrl.u32 %v1057_v46, %v556_v42  ;;  %v562_v50 = vshrl.u32 %v1058_v49, %v556_v42  ;;  %v565_v53 = vshrl.u32 %v1059_v52, %v556_v42  ;;  %v568_v56 = vshrl.u32 %v1060_v55, %v556_v42 }
 0x27c   : > { %v571_v59 = vshrl.u32 %v1061_v58, %v556_v42  ;;  %v557_v5 = vshrl.u32 %v1056_v44, %v556_v42  ;;  %vm575_vm7 = vcmp.lt.s32.totalorder %v554_v43, 3  ;;  %vm574_vm8 = vcmp.lt.s32.totalorder %v554_v43, 2 }
 0x27d   : > { %v560_v61 = vor.u32 %v559_v48, %v558_v45  ;;  %v563_v62 = vor.u32 %v562_v50, %v561_v47  ;;  %v566_v63 = vor.u32 %v565_v53, %v564_v51  ;;  %v569_v0 = vor.u32 %v568_v56, %v567_v54 }
 0x27e   : > { %v572_v1 = vor.u32 %v571_v59, %v570_v57 }
 0x27f   : > { %v578_v2 = vsel %vm576_vm6, %v566_v63, 2102212464  ;;  %v581_v3 = vsel %vm573_vm5, %v560_v61, %v563_v62  ;;  %v585_v4 = vsel %vm573_vm5, %v563_v62, %v566_v63  ;;  %v582_v6 = vsel %vm576_vm6, %v569_v0, 920167782 }
 0x280   : > { %v586_v7 = vsel %vm576_vm6, %v572_v1, 1326507024  ;;  %v583_v8 = vsel %vm575_vm7, %v566_v63, %v582_v6  ;;  %v577_v11 = vsel %vm573_vm5, %v557_v5, %v560_v61  ;;  %v579_v12 = vsel %vm575_vm7, %v563_v62, %v578_v2 }
 0x281   : > { %v587_v9 = vsel %vm575_vm7, %v569_v0, %v586_v7  ;;  %v584_v13 = vsel %vm574_vm8, %v581_v3, %v583_v8  ;;  %v580_v19 = vsel %vm574_vm8, %v577_v11, %v579_v12 }
 0x282   : > { %v588_v14 = vsel %vm574_vm8, %v585_v4, %v587_v9  ;;  %v1245_v17 = vmul.u32.u64.low %v589_v10, %v584_v13  ;;  %v1246_v18 = vmul.u32.u64.high %v589_v10, %v584_v13, %v1245_v17  ;;  %v596_v21 = vmul.u32 %v589_v10, %v580_v19 }
 0x283   : > { %v1242_v15 = vmul.u32.u64.low %v589_v10, %v588_v14  ;;  %v1243_v16 = vmul.u32.u64.high %v589_v10, %v588_v14, %v1242_v15 }
 0x284   : > { %v599_v20 = vadd.s32 1, %v1246_v18 }
 0x285   : > { %vm598_vm9 = vc.u32 %v1243_v16, %v1245_v17  ;;  %v597_v35 = vadd.s32 %v1245_v17, %v1243_v16 }
 0x286   : > { %v600_v22 = vsel %vm598_vm9, %v599_v20, %v1246_v18 }
 0x287   : > { %v601_v23 = vadd.s32 %v600_v22, %v596_v21 }
 0x289   : > { %v602_v24 = vadd.s32 536870912, %v601_v23 }
 0x28b   : > { %v603_v25 = vshrl.u32 %v602_v24, 30 }
 0x28d   : > { %v604_v26 = vshll.u32 %v603_v25, 30  ;;  %v627_v49 = vsub.s32 4, %v603_v25 }
 0x28f   : > { %v605_v27 = vsub.s32 %v601_v23, %v604_v26  ;;  %v628_v52 = vsel %vm543_vm11, %v627_v49, %v603_v25 }
 0x290   : > { %v630_v53 = vsel %vm542_vm12, 0, %v628_v52 }
 0x291   : > { %v607_v28 = vsub.s32 0, %v605_v27  ;;  %v634_v54 = vadd.s32 3, %v630_v53 }
 0x293   : > { %v774_v29 = vmin.u32 %v607_v28, %v605_v27  ;;  %v635_v55 = vand.u32 3, %v634_v54 }
 0x295   : > { %v609_v30 = vclz %v774_v29  ;;  %vm640_vm13 = vcmp.eq.s32.totalorder %v635_v55, 2  ;;  %vm637_vm14 = vcmp.eq.s32.totalorder %v635_v55, 0  ;;  %vm636_vm15 = vcmp.lt.s32.totalorder %v635_v55, 2 }
 0x297   : > { %v775_v32 = vadd.s32 4294967294, %v609_v30 }
 0x299   : > { %vm776_vm10 = vcmp.lt.s32.totalorder %v775_v32, 0 }
 0x29a   : > { %v612_v34 = vsel %vm776_vm10, 0, %v775_v32 }
 0x29b   : > { %v613_v36 = vsub.s32 32, %v612_v34  ;;  %v617_v37 = vsub.s32 4294967266, %v612_v34  ;;  %v614_v39 = vshll.u32 %v605_v27, %v612_v34 }
 0x29d   : > { %v615_v40 = vshrl.u32 %v597_v35, %v613_v36  ;;  %v618_v41 = vadd.s32 127, %v617_v37 }
 0x29f   : > { %v616_v42 = vor.u32 %v615_v40, %v614_v39  ;;  %v619_v43 = vshll.u32 %v618_v41, 23 }
 0x2a1   : > { %v620_v44 = vor.u32 4788187, %v619_v43  ;;  %v623_v46 = vcvt.s32.f32 %v616_v42 }
 0x2a3   : > { %v621_v45 = vand.u32 2147483647, %v620_v44 }
 0x2a5   : > { %v624_v47 = vmul.f32 %v623_v46, %v621_v45 }
 0x2a7   : > { %v625_v48 = vxor.u32 2147483648, %v624_v47 }
 0x2a9   : > { %v626_v50 = vsel %vm543_vm11, %v625_v48, %v624_v47 }
 0x2aa   : > { %v629_v51 = vsel %vm542_vm12, %v1236_v33, %v626_v50 }
 0x2ab   : > { %904 = vcosq.f32 %v629_v51 }
 0x2ac   : > { %906 = vsinq.f32 %v629_v51 }
 0x2b8   : > { %v905_v56 = vpop.eup %904 }
 0x2b9   : > { %v907_v57 = vpop.eup %906  ;;  %v641_v58 = vxor.u32 2147483648, %v905_v56 }
 0x2ba   : > { %v638_v59 = vxor.u32 2147483648, %v907_v57 }
 0x2bb   : > { %v642_v60 = vsel %vm640_vm13, %v641_v58, %v907_v57 }
 0x2bc   : > { %v639_v38 = vsel %vm637_vm14, %v905_v56, %v638_v59 }
 0x2bd   : > { %v643_v61 = vsel %vm636_vm15, %v639_v38, %v642_v60 }
 0x2be   : > { %v644_v62 = vsel %vm633_vm0, nan, %v643_v61 }
 0x2bf   : > { %v645_v63 = vmul.f32 %v644_v62, %v644_v62 }
 0x2c1   : > { %v646_v0 = vmul.f32 5.0, %v645_v63 }
 0x2c3   : > { %v647_v1 = vadd.f32 %v646_v0, %v1233_v31 }
 0x2c5   : > { %648 = vst [vmem:[%s273_s24] sm:$0xff] %v647_v1 }
 0x2c6   : > { %975 = shalt.err (!%p972_p9)
}
 0x2c7   : > { %s976_s29 = scalar_lea.hbm %s662_s28, 128  ;;  %s980_s10 = scalar_lea.hbm %s1304_s5, 256 }
 0x2c8   : > { %p977_p0 = scmp.ne.s32.totalorder %s662_s28, %s976_s29  ;;  %p981_p10 = scmp.lt.s32.totalorder %s662_s28, %s1304_s5 }
 0x2c9   : > { %p982_p11 = scmp.lt.s32.totalorder %s980_s10, %s976_s29 }
 0x2ca   : > { %p978_p2 = pnand %p977_p0, %p1324_p13 }
 0x2cb   : > { %p983_p5 = por %p982_p11, %p981_p10 }
 0x2cc   : > { %p979_p6 = pneg %p978_p2 }
 0x2ce   : > { %p984_p3 = pnand %p983_p5, %p979_p6 }
 0x2d0   : > { %987 = shalt.err (!%p984_p3)
}
 0x2d1   : > { %819 = dma.vmem_to_hbm [thread:$0]  (%p1324_p13), %s665_s17, 128, %s662_s28, %s650_s12  }
 0x2d2 PF: > { %s1325_s14 = sld [smem:[#allocation11_spill]]  ;;  %s676_s15 = sand.u32 1, %s1026_s18  }
 0x2d3   : > { %p1326_p4 = scmp.ne.s32.totalorder %s1316_s6, 0  ;;  %s677_s9 = scalar_lea.sflag [#allocation4], %s676_s15 }
 0x2d8   : > { %p1327_p1 = scmp.ge.s32.totalorder %s1325_s14, 2 }
 0x2da   : > { %p830_p12 = pnand %p1327_p1, %p1326_p4 }
 0x2dc   : > { %p831_p7 = pneg %p830_p12 }
 0x2de   : > { %1021 = dma.done.wait (%p831_p7), %s677_s9, 128  }
 0x2df   : > { %1023 = vsyncadd (%p831_p7), %s677_s9, 4294967168  ;;  %s22_s23 = sadd.s32 1, %s1325_s14   ;;  %s1328_s30 = sld [smem:[#allocation12_spill]] }
 0x2e0   : > { %p19_p8 = scmp.ge.s32.totalorder %s22_s23, 4   ;;  %s1329_s18 = smov %s1030_s19 }
 0x2e1   : > { %s1330_s19 = smov %s1034_s20  ;;  %s1331_s20 = smov %s1195_s16 }
 0x2e2   : > { %s1332_s21 = smov %s1042_s22  ;;  %21 = sbr.rel (!%p19_p8) target bundleno = 9 (0x9), region = 90 }
 0x2e5   : > { %s1333_s22 = smov %s1328_s30 }
 0x2e7   :  { %682 = vsyncpa [#allocation3], 1 }
 0x2e8   :  { %684 = vsyncpa [#allocation3 + $0x1], 1 }
 0x2e9   :  { %685 = vsyncpa [#allocation6], 1 }
 0x2ea   :  { %686 = vsyncpa [#allocation4], 1 }
 0x2eb   :  { %688 = vsyncpa [#allocation4 + $0x1], 1 }

</bundles_post_ra>
